<compile_context>
chip_gen: v6e
topology: v6e:2x2x1
jax: 0.10.0
libtpu: 0.0.40
codegen_flags: <defaults>
</compile_context>

<pallas_src>
import math
import functools

import jax
import jax.numpy as jnp
from jax import lax
from jax.experimental import pallas as pl
from jax.experimental.pallas import tpu as pltpu


def _erf(x):
    # Abramowitz & Stegun 7.1.26 rational approximation (|err| < 1.5e-7), built only
    # from ops that lower cleanly in Mosaic (abs / exp / mul / add / select).
    a1, a2, a3, a4, a5 = (0.254829592, -0.284496736, 1.421413741,
                          -1.453152027, 1.061405429)
    p = 0.3275911
    s = jnp.where(x >= 0.0, 1.0, -1.0)
    ax = jnp.abs(x)
    t = 1.0 / (1.0 + p * ax)                       # divide + exp ride the EUP slot
    poly = ((((a5 * t + a4) * t + a3) * t + a2) * t + a1) * t
    return s * (1.0 - poly * jnp.exp(-ax * ax))


def _gelu_exact(x):
    # nn.GELU() default (erf-based, not tanh-approximate).
    return 0.5 * x * (1.0 + _erf(x * (1.0 / math.sqrt(2.0))))


def _residual_block_kernel(x_ref, w1_ref, s1_ref, t1_ref,
                           w2_ref, s2_ref, t2_ref,
                           wd_ref, sd_ref, td_ref,
                           out_ref, *, L, K, dilation):
    R = x_ref.shape[0]                 # rows in this block = (batches per block) * L
    half = (K - 1) // 2

    x = x_ref[...]                                              # (R, Cin)

    # Per-tap validity masks depend only on the position within each length-L sequence.
    # Compute them once and reuse for both dilated convs (same K / dilation).
    pos = lax.broadcasted_iota(jnp.int32, (R, 1), 0) % L
    masks = {}
    for j in range(K):
        off = (j - half) * dilation
        if off != 0:
            valid = jnp.logical_and(pos + off >= 0, pos + off < L)
            masks[off] = valid.astype(jnp.float32)              # (R, 1)

    def conv_taps(a):
        # (R, C) -> (R, K*C): K shifted copies (zero outside each length-L sequence,
        # matching PyTorch 'same' zero padding), lane-concatenated so each dilated
        # Conv1d becomes a single MXU matmul with contraction K*C.
        cols = []
        for j in range(K):
            off = (j - half) * dilation
            if off == 0:
                cols.append(a)
            else:
                # shifted[r] = a[(r + off) mod R]; rows that would read outside the
                # current sequence (or across a batch boundary) are masked to zero.
                shifted = pltpu.roll(a, shift=(-off) % R, axis=0)
                cols.append(shifted * masks[off])
        return jnp.concatenate(cols, axis=-1)

    # conv1 -> bn1 (folded scale/shift) -> GELU   (dropout = eval-mode identity)
    h1 = jnp.dot(conv_taps(x), w1_ref[...], preferred_element_type=jnp.float32)
    h1 = _gelu_exact(h1 * s1_ref[...] + t1_ref[...])

    # conv2 -> bn2 (folded scale/shift)
    h2 = jnp.dot(conv_taps(h1), w2_ref[...], preferred_element_type=jnp.float32)
    h2 = h2 * s2_ref[...] + t2_ref[...]

    # downsample residual: 1x1 conv + BN on the MXU (identity weights when in_ch == out_ch)
    res = jnp.dot(x, wd_ref[...], preferred_element_type=jnp.float32)
    res = res * sd_ref[...] + td_ref[...]

    # residual add + final GELU, single lane-dense store
    out_ref[...] = _gelu_exact(h2 + res)


def residual_block_pallas(x_rows, p, *, L, K, dilation, batch_blocks=1):
    """x_rows: (B*L, Cin) -> (B*L, Cout)."""
    R, Cin = x_rows.shape
    Cout = p["w1"].shape[1]
    B = R // L
    assert R == B * L and B % batch_blocks == 0
    rb = (B // batch_blocks) * L           # rows per grid step

    kernel = functools.partial(_residual_block_kernel, L=L, K=K, dilation=dilation)
    return pl.pallas_call(
        kernel,
        out_shape=jax.ShapeDtypeStruct((R, Cout), jnp.float32),
        grid_spec=pltpu.PrefetchScalarGridSpec(
            num_scalar_prefetch=0,
            grid=(batch_blocks,),
            in_specs=[
                pl.BlockSpec((rb, Cin), lambda g: (g, 0)),          # activations (rows, chan)
                pl.BlockSpec((K * Cin, Cout), lambda g: (0, 0)),    # conv1 weight (tap-major)
                pl.BlockSpec((1, Cout), lambda g: (0, 0)),          # bn1 scale
                pl.BlockSpec((1, Cout), lambda g: (0, 0)),          # bn1 shift
                pl.BlockSpec((K * Cout, Cout), lambda g: (0, 0)),   # conv2 weight (tap-major)
                pl.BlockSpec((1, Cout), lambda g: (0, 0)),          # bn2 scale
                pl.BlockSpec((1, Cout), lambda g: (0, 0)),          # bn2 shift
                pl.BlockSpec((Cin, Cout), lambda g: (0, 0)),        # downsample 1x1 weight
                pl.BlockSpec((1, Cout), lambda g: (0, 0)),          # downsample scale
                pl.BlockSpec((1, Cout), lambda g: (0, 0)),          # downsample shift
            ],
            out_specs=pl.BlockSpec((rb, Cout), lambda g: (g, 0)),   # lane-dense output
        ),
        compiler_params=pltpu.CompilerParams(dimension_semantics=("parallel",)),
    )(x_rows, p["w1"], p["s1"], p["t1"], p["w2"], p["s2"], p["t2"],
      p["wd"], p["sd"], p["td"])


def residual_block_forward(x, folded, *, kernel_size, dilation, batch_blocks=1):
    """x: (B, in_ch, L) float32 -> (B, out_ch, L) float32, matching ResidualBlock.forward (eval)."""
    B, Cin, L = x.shape
    Cout = folded["w1"].shape[1]
    # host-side layout glue only (transpose/reshape); all MACs run inside the kernel
    x_rows = jnp.transpose(x, (0, 2, 1)).reshape(B * L, Cin)
    out_rows = residual_block_pallas(x_rows, folded, L=L, K=kernel_size,
                                     dilation=dilation, batch_blocks=batch_blocks)
    return jnp.transpose(out_rows.reshape(B, L, Cout), (0, 2, 1))


# ----------------------------- parameter construction -----------------------------

def init_torch_params(in_ch, out_ch, kernel_size, seed=42):
    """PyTorch-layout parameters of ResidualBlock (Conv1d OIK weights, BN running stats)."""
    K = kernel_size
    ks = jax.random.split(jax.random.PRNGKey(seed), 18)
    p = dict(
        w1=0.2 * jax.random.normal(ks[0], (out_ch, in_ch, K), jnp.float32),   # Conv1d(in,out,K)
        b1=0.1 * jax.random.normal(ks[1], (out_ch,), jnp.float32),
        g1=1.0 + 0.1 * jax.random.normal(ks[2], (out_ch,), jnp.float32),      # BatchNorm1d(out)
        be1=0.1 * jax.random.normal(ks[3], (out_ch,), jnp.float32),
        m1=0.1 * jax.random.normal(ks[4], (out_ch,), jnp.float32),
        v1=jax.random.uniform(ks[5], (out_ch,), jnp.float32, 0.5, 1.5),
        w2=0.1 * jax.random.normal(ks[6], (out_ch, out_ch, K), jnp.float32),  # Conv1d(out,out,K)
        b2=0.1 * jax.random.normal(ks[7], (out_ch,), jnp.float32),
        g2=1.0 + 0.1 * jax.random.normal(ks[8], (out_ch,), jnp.float32),      # BatchNorm1d(out)
        be2=0.1 * jax.random.normal(ks[9], (out_ch,), jnp.float32),
        m2=0.1 * jax.random.normal(ks[10], (out_ch,), jnp.float32),
        v2=jax.random.uniform(ks[11], (out_ch,), jnp.float32, 0.5, 1.5),
    )
    if in_ch != out_ch:                                                        # downsample branch
        p.update(
            wd=0.2 * jax.random.normal(ks[12], (out_ch, in_ch, 1), jnp.float32),
            bd=0.1 * jax.random.normal(ks[13], (out_ch,), jnp.float32),
            gd=1.0 + 0.1 * jax.random.normal(ks[14], (out_ch,), jnp.float32),
            bed=0.1 * jax.random.normal(ks[15], (out_ch,), jnp.float32),
            md=0.1 * jax.random.normal(ks[16], (out_ch,), jnp.float32),
            vd=jax.random.uniform(ks[17], (out_ch,), jnp.float32, 0.5, 1.5),
        )
    return p


def fold_params(tp, in_ch, out_ch, kernel_size, eps=1e-5):
    """Fold conv bias + eval-mode BN into scale/shift and reorder weights tap-major."""
    K = kernel_size
    s1 = tp["g1"] / jnp.sqrt(tp["v1"] + eps)
    t1 = (tp["b1"] - tp["m1"]) * s1 + tp["be1"]
    s2 = tp["g2"] / jnp.sqrt(tp["v2"] + eps)
    t2 = (tp["b2"] - tp["m2"]) * s2 + tp["be2"]
    w1 = jnp.transpose(tp["w1"], (2, 1, 0)).reshape(K * in_ch, out_ch)    # (tap, in, out)
    w2 = jnp.transpose(tp["w2"], (2, 1, 0)).reshape(K * out_ch, out_ch)
    if in_ch != out_ch:
        sd = tp["gd"] / jnp.sqrt(tp["vd"] + eps)
        td = (tp["bd"] - tp["md"]) * sd + tp["bed"]
        wd = jnp.transpose(tp["wd"][:, :, 0], (1, 0))                      # (in, out)
    else:  # no downsample -> identity residual path through the same kernel
        sd = jnp.ones((out_ch,), jnp.float32)
        td = jnp.zeros((out_ch,), jnp.float32)
        wd = jnp.eye(in_ch, dtype=jnp.float32)
    return dict(w1=w1, s1=s1.reshape(1, out_ch), t1=t1.reshape(1, out_ch),
                w2=w2, s2=s2.reshape(1, out_ch), t2=t2.reshape(1, out_ch),
                wd=wd, sd=sd.reshape(1, out_ch), td=td.reshape(1, out_ch))


# ----------------------------- pure-JAX reference (for validation) -----------------------------

def residual_block_ref(x, tp, *, in_ch, out_ch, kernel_size, dilation, eps=1e-5):
    K = kernel_size
    pad = dilation * (K - 1) // 2
    gelu = functools.partial(jax.nn.gelu, approximate=False)

    def conv(y, w, b, dil, p):
        o = lax.conv_general_dilated(y, w, window_strides=(1,), padding=[(p, p)],
                                     rhs_dilation=(dil,),
                                     dimension_numbers=("NCH", "OIH", "NCH"),
                                     precision=lax.Precision.HIGHEST)
        return o + b[None, :, None]

    def bn(y, g, b, m, v):
        s = g / jnp.sqrt(v + eps)
        return (y - m[None, :, None]) * s[None, :, None] + b[None, :, None]

    out = conv(x, tp["w1"], tp["b1"], dilation, pad)
    out = gelu(bn(out, tp["g1"], tp["be1"], tp["m1"], tp["v1"]))   # dropout = identity (eval)
    out = conv(out, tp["w2"], tp["b2"], dilation, pad)
    out = bn(out, tp["g2"], tp["be2"], tp["m2"], tp["v2"])
    if in_ch != out_ch:
        res = conv(x, tp["wd"], tp["bd"], 1, 0)
        res = bn(res, tp["gd"], tp["bed"], tp["md"], tp["vd"])
    else:
        res = x
    return gelu(out + res)


if __name__ == "__main__":
    B, Cin, Cout, L = 2, 4, 32, 16          # batch, in_channels, out_channels, seq_len
    K, dilation = 3, 2                       # kernel_size, dilation ('same' padding)

    x = jax.random.normal(jax.random.PRNGKey(0), (B, Cin, L), dtype=jnp.float32)
    tp = init_torch_params(Cin, Cout, K, seed=42)
    folded = fold_params(tp, Cin, Cout, K)

    # batch_blocks=1 merges the batch into one grid step (best on single-TC v5e/v6e);
    # set batch_blocks=2 on v7x to spread the batch over both TensorCores.
    fn = jax.jit(functools.partial(residual_block_forward,
                                   kernel_size=K, dilation=dilation, batch_blocks=1))
    out = fn(x, folded)
    jax.block_until_ready(out)
    assert out.shape == (B, Cout, L) and out.dtype == jnp.float32

    # tolerant check vs. plain-JAX reference (MXU matmul precision + erf approx wobble)
    ref = residual_block_ref(x, tp, in_ch=Cin, out_ch=Cout,
                             kernel_size=K, dilation=dilation)
    max_err = float(jnp.max(jnp.abs(out - ref)))
    assert max_err < 2e-2, f"max abs error {max_err}"

    print("KERNEL_OK")
</pallas_src>

<mosaic_0001>
module attributes {stable_mosaic.version = 11 : i64} {
  func.func @_residual_block_kernel(%arg0: i32, %arg1: memref<32x4xf32, #tpu.memory_space<vmem>>, %arg2: memref<12x32xf32, #tpu.memory_space<vmem>>, %arg3: memref<1x32xf32, #tpu.memory_space<vmem>>, %arg4: memref<1x32xf32, #tpu.memory_space<vmem>>, %arg5: memref<96x32xf32, #tpu.memory_space<vmem>>, %arg6: memref<1x32xf32, #tpu.memory_space<vmem>>, %arg7: memref<1x32xf32, #tpu.memory_space<vmem>>, %arg8: memref<4x32xf32, #tpu.memory_space<vmem>>, %arg9: memref<1x32xf32, #tpu.memory_space<vmem>>, %arg10: memref<1x32xf32, #tpu.memory_space<vmem>>, %arg11: memref<32x32xf32, #tpu.memory_space<vmem>>) attributes {dimension_semantics = [#tpu.dimension_semantics<parallel>], iteration_bounds = array<i64: 1>, scalar_prefetch = 0 : i64, scratch_operands = 0 : i64, tpu.core_type = #tpu.core_type<tc>, window_params = [{transform_indices = @transform_0, window_bounds = array<i64: 32, 4>}, {pipeline_mode = #tpu.pipeline_mode<synchronous>, transform_indices = @transform_1, window_bounds = array<i64: 12, 32>}, {pipeline_mode = #tpu.pipeline_mode<synchronous>, transform_indices = @transform_2, window_bounds = array<i64: 1, 32>}, {pipeline_mode = #tpu.pipeline_mode<synchronous>, transform_indices = @transform_3, window_bounds = array<i64: 1, 32>}, {pipeline_mode = #tpu.pipeline_mode<synchronous>, transform_indices = @transform_4, window_bounds = array<i64: 96, 32>}, {pipeline_mode = #tpu.pipeline_mode<synchronous>, transform_indices = @transform_5, window_bounds = array<i64: 1, 32>}, {pipeline_mode = #tpu.pipeline_mode<synchronous>, transform_indices = @transform_6, window_bounds = array<i64: 1, 32>}, {pipeline_mode = #tpu.pipeline_mode<synchronous>, transform_indices = @transform_7, window_bounds = array<i64: 4, 32>}, {pipeline_mode = #tpu.pipeline_mode<synchronous>, transform_indices = @transform_8, window_bounds = array<i64: 1, 32>}, {pipeline_mode = #tpu.pipeline_mode<synchronous>, transform_indices = @transform_9, window_bounds = array<i64: 1, 32>}, {transform_indices = @transform_10, window_bounds = array<i64: 32, 32>}]} {
    %c0 = arith.constant 0 : index
    %c0_0 = arith.constant 0 : index
    %0 = vector.load %arg1[%c0, %c0_0] : memref<32x4xf32, #tpu.memory_space<vmem>>, vector<32x4xf32>
    %1 = tpu.iota {dimensions = array<i32: 0>} : vector<32x1xi32>
    %c16_i32 = arith.constant 16 : i32
    %c0_i32 = arith.constant 0 : i32
    %2 = arith.cmpi eq, %c16_i32, %c0_i32 : i32
    %c1_i32 = arith.constant 1 : i32
    %3 = arith.select %2, %c1_i32, %c16_i32 : i32
    %4 = vector.broadcast %3 : i32 to vector<32x1xi32>
    %5 = arith.remsi %1, %4 : vector<32x1xi32>
    %c0_i32_1 = arith.constant 0 : i32
    %6 = vector.broadcast %c0_i32_1 : i32 to vector<32x1xi32>
    %7 = arith.cmpi ne, %5, %6 : vector<32x1xi32>
    %c0_i32_2 = arith.constant 0 : i32
    %8 = vector.broadcast %c0_i32_2 : i32 to vector<32x1xi32>
    %9 = arith.cmpi slt, %5, %8 : vector<32x1xi32>
    %c0_i32_3 = arith.constant 0 : i32
    %10 = arith.cmpi slt, %3, %c0_i32_3 : i32
    %11 = vector.broadcast %10 : i1 to vector<32x1xi1>
    %12 = vector.broadcast %11 : vector<32x1xi1> to vector<32x1xi1>
    %13 = arith.xori %9, %12 : vector<32x1xi1>
    %14 = arith.andi %13, %7 : vector<32x1xi1>
    %15 = vector.broadcast %3 : i32 to vector<32x1xi32>
    %16 = arith.addi %5, %15 : vector<32x1xi32>
    %17 = arith.select %14, %16, %5 : vector<32x1xi1>, vector<32x1xi32>
    %c-2_i32 = arith.constant -2 : i32
    %18 = vector.broadcast %c-2_i32 : i32 to vector<32x1xi32>
    %19 = arith.addi %17, %18 : vector<32x1xi32>
    %c0_i32_4 = arith.constant 0 : i32
    %20 = vector.broadcast %c0_i32_4 : i32 to vector<32x1xi32>
    %21 = arith.cmpi sge, %19, %20 : vector<32x1xi32>
    %c-2_i32_5 = arith.constant -2 : i32
    %22 = vector.broadcast %c-2_i32_5 : i32 to vector<32x1xi32>
    %23 = arith.addi %17, %22 : vector<32x1xi32>
    %c16_i32_6 = arith.constant 16 : i32
    %24 = vector.broadcast %c16_i32_6 : i32 to vector<32x1xi32>
    %25 = arith.cmpi slt, %23, %24 : vector<32x1xi32>
    %26 = arith.andi %21, %25 : vector<32x1xi1>
    %27 = arith.extui %26 : vector<32x1xi1> to vector<32x1xi32>
    %28 = arith.sitofp %27 : vector<32x1xi32> to vector<32x1xf32>
    %c2_i32 = arith.constant 2 : i32
    %29 = vector.broadcast %c2_i32 : i32 to vector<32x1xi32>
    %30 = arith.addi %17, %29 : vector<32x1xi32>
    %c0_i32_7 = arith.constant 0 : i32
    %31 = vector.broadcast %c0_i32_7 : i32 to vector<32x1xi32>
    %32 = arith.cmpi sge, %30, %31 : vector<32x1xi32>
    %c2_i32_8 = arith.constant 2 : i32
    %33 = vector.broadcast %c2_i32_8 : i32 to vector<32x1xi32>
    %34 = arith.addi %17, %33 : vector<32x1xi32>
    %c16_i32_9 = arith.constant 16 : i32
    %35 = vector.broadcast %c16_i32_9 : i32 to vector<32x1xi32>
    %36 = arith.cmpi slt, %34, %35 : vector<32x1xi32>
    %37 = arith.andi %32, %36 : vector<32x1xi1>
    %38 = arith.extui %37 : vector<32x1xi1> to vector<32x1xi32>
    %39 = arith.sitofp %38 : vector<32x1xi32> to vector<32x1xf32>
    %c2_i32_10 = arith.constant 2 : i32
    %40 = tpu.dynamic_rotate %0 by %c2_i32_10 dim 0 : vector<32x4xf32>, i32 -> vector<32x4xf32>
    %41 = vector.broadcast %28 : vector<32x1xf32> to vector<32x4xf32>
    %42 = arith.mulf %40, %41 : vector<32x4xf32>
    %c30_i32 = arith.constant 30 : i32
    %43 = tpu.dynamic_rotate %0 by %c30_i32 dim 0 : vector<32x4xf32>, i32 -> vector<32x4xf32>
    %44 = vector.broadcast %39 : vector<32x1xf32> to vector<32x4xf32>
    %45 = arith.mulf %43, %44 : vector<32x4xf32>
    %46 = tpu.concatenate %42, %0, %45 in 1 : vector<32x4xf32>, vector<32x4xf32>, vector<32x4xf32> -> vector<32x12xf32>
    %c0_11 = arith.constant 0 : index
    %c0_12 = arith.constant 0 : index
    %47 = vector.load %arg2[%c0_11, %c0_12] : memref<12x32xf32, #tpu.memory_space<vmem>>, vector<12x32xf32>
    %cst = arith.constant dense<0.000000e+00> : vector<32x32xf32>
    %48 = tpu.matmul %46, %47, %cst {dimension_numbers = #tpu.dot_dimension_numbers<[1], [0], [0], [1], [0, 0, 1, 1], [], []>} : vector<32x12xf32>, vector<12x32xf32>, vector<32x32xf32> -> vector<32x32xf32>
    %c0_13 = arith.constant 0 : index
    %c0_14 = arith.constant 0 : index
    %49 = vector.load %arg3[%c0_13, %c0_14] : memref<1x32xf32, #tpu.memory_space<vmem>>, vector<1x32xf32>
    %50 = vector.broadcast %49 : vector<1x32xf32> to vector<32x32xf32>
    %51 = arith.mulf %48, %50 : vector<32x32xf32>
    %c0_15 = arith.constant 0 : index
    %c0_16 = arith.constant 0 : index
    %52 = vector.load %arg4[%c0_15, %c0_16] : memref<1x32xf32, #tpu.memory_space<vmem>>, vector<1x32xf32>
    %53 = vector.broadcast %52 : vector<1x32xf32> to vector<32x32xf32>
    %54 = arith.addf %51, %53 : vector<32x32xf32>
    %cst_17 = arith.constant 5.000000e-01 : f32
    %55 = vector.broadcast %cst_17 : f32 to vector<32x32xf32>
    %56 = arith.mulf %55, %54 : vector<32x32xf32>
    %cst_18 = arith.constant 0.707106769 : f32
    %57 = vector.broadcast %cst_18 : f32 to vector<32x32xf32>
    %58 = arith.mulf %54, %57 : vector<32x32xf32>
    %cst_19 = arith.constant 0.000000e+00 : f32
    %59 = vector.broadcast %cst_19 : f32 to vector<32x32xf32>
    %60 = arith.cmpf oge, %58, %59 : vector<32x32xf32>
    %cst_20 = arith.constant 1.000000e+00 : f32
    %cst_21 = arith.constant -1.000000e+00 : f32
    %61 = vector.broadcast %cst_20 : f32 to vector<32x32xf32>
    %62 = vector.broadcast %cst_21 : f32 to vector<32x32xf32>
    %63 = arith.select %60, %61, %62 : vector<32x32xi1>, vector<32x32xf32>
    %64 = math.absf %58 : vector<32x32xf32>
    %cst_22 = arith.constant 0.327591091 : f32
    %65 = vector.broadcast %cst_22 : f32 to vector<32x32xf32>
    %66 = arith.mulf %65, %64 : vector<32x32xf32>
    %cst_23 = arith.constant 1.000000e+00 : f32
    %67 = vector.broadcast %cst_23 : f32 to vector<32x32xf32>
    %68 = arith.addf %67, %66 : vector<32x32xf32>
    %cst_24 = arith.constant 1.000000e+00 : f32
    %69 = vector.broadcast %cst_24 : f32 to vector<32x32xf32>
    %70 = arith.divf %69, %68 : vector<32x32xf32>
    %cst_25 = arith.constant 1.06140542 : f32
    %71 = vector.broadcast %cst_25 : f32 to vector<32x32xf32>
    %72 = arith.mulf %71, %70 : vector<32x32xf32>
    %cst_26 = arith.constant -1.45315206 : f32
    %73 = vector.broadcast %cst_26 : f32 to vector<32x32xf32>
    %74 = arith.addf %72, %73 : vector<32x32xf32>
    %75 = arith.mulf %74, %70 : vector<32x32xf32>
    %cst_27 = arith.constant 1.42141378 : f32
    %76 = vector.broadcast %cst_27 : f32 to vector<32x32xf32>
    %77 = arith.addf %75, %76 : vector<32x32xf32>
    %78 = arith.mulf %77, %70 : vector<32x32xf32>
    %cst_28 = arith.constant -0.284496725 : f32
    %79 = vector.broadcast %cst_28 : f32 to vector<32x32xf32>
    %80 = arith.addf %78, %79 : vector<32x32xf32>
    %81 = arith.mulf %80, %70 : vector<32x32xf32>
    %cst_29 = arith.constant 0.254829586 : f32
    %82 = vector.broadcast %cst_29 : f32 to vector<32x32xf32>
    %83 = arith.addf %81, %82 : vector<32x32xf32>
    %84 = arith.mulf %83, %70 : vector<32x32xf32>
    %cst_30 = arith.constant 0.000000e+00 : f32
    %85 = vector.broadcast %cst_30 : f32 to vector<32x32xf32>
    %86 = arith.subf %85, %64 : vector<32x32xf32>
    %87 = arith.mulf %86, %64 : vector<32x32xf32>
    %88 = math.exp %87 : vector<32x32xf32>
    %89 = arith.mulf %84, %88 : vector<32x32xf32>
    %cst_31 = arith.constant 1.000000e+00 : f32
    %90 = vector.broadcast %cst_31 : f32 to vector<32x32xf32>
    %91 = arith.subf %90, %89 : vector<32x32xf32>
    %92 = arith.mulf %63, %91 : vector<32x32xf32>
    %cst_32 = arith.constant 1.000000e+00 : f32
    %93 = vector.broadcast %cst_32 : f32 to vector<32x32xf32>
    %94 = arith.addf %93, %92 : vector<32x32xf32>
    %95 = arith.mulf %56, %94 : vector<32x32xf32>
    %c2_i32_33 = arith.constant 2 : i32
    %96 = tpu.dynamic_rotate %95 by %c2_i32_33 dim 0 : vector<32x32xf32>, i32 -> vector<32x32xf32>
    %97 = vector.broadcast %28 : vector<32x1xf32> to vector<32x32xf32>
    %98 = arith.mulf %96, %97 : vector<32x32xf32>
    %c30_i32_34 = arith.constant 30 : i32
    %99 = tpu.dynamic_rotate %95 by %c30_i32_34 dim 0 : vector<32x32xf32>, i32 -> vector<32x32xf32>
    %100 = vector.broadcast %39 : vector<32x1xf32> to vector<32x32xf32>
    %101 = arith.mulf %99, %100 : vector<32x32xf32>
    %102 = tpu.concatenate %98, %95, %101 in 1 : vector<32x32xf32>, vector<32x32xf32>, vector<32x32xf32> -> vector<32x96xf32>
    %c0_35 = arith.constant 0 : index
    %c0_36 = arith.constant 0 : index
    %103 = vector.load %arg5[%c0_35, %c0_36] : memref<96x32xf32, #tpu.memory_space<vmem>>, vector<96x32xf32>
    %cst_37 = arith.constant dense<0.000000e+00> : vector<32x32xf32>
    %104 = tpu.matmul %102, %103, %cst_37 {dimension_numbers = #tpu.dot_dimension_numbers<[1], [0], [0], [1], [0, 0, 1, 1], [], []>} : vector<32x96xf32>, vector<96x32xf32>, vector<32x32xf32> -> vector<32x32xf32>
    %c0_38 = arith.constant 0 : index
    %c0_39 = arith.constant 0 : index
    %105 = vector.load %arg6[%c0_38, %c0_39] : memref<1x32xf32, #tpu.memory_space<vmem>>, vector<1x32xf32>
    %106 = vector.broadcast %105 : vector<1x32xf32> to vector<32x32xf32>
    %107 = arith.mulf %104, %106 : vector<32x32xf32>
    %c0_40 = arith.constant 0 : index
    %c0_41 = arith.constant 0 : index
    %108 = vector.load %arg7[%c0_40, %c0_41] : memref<1x32xf32, #tpu.memory_space<vmem>>, vector<1x32xf32>
    %109 = vector.broadcast %108 : vector<1x32xf32> to vector<32x32xf32>
    %110 = arith.addf %107, %109 : vector<32x32xf32>
    %c0_42 = arith.constant 0 : index
    %c0_43 = arith.constant 0 : index
    %111 = vector.load %arg8[%c0_42, %c0_43] : memref<4x32xf32, #tpu.memory_space<vmem>>, vector<4x32xf32>
    %cst_44 = arith.constant dense<0.000000e+00> : vector<32x32xf32>
    %112 = tpu.matmul %0, %111, %cst_44 {dimension_numbers = #tpu.dot_dimension_numbers<[1], [0], [0], [1], [0, 0, 1, 1], [], []>} : vector<32x4xf32>, vector<4x32xf32>, vector<32x32xf32> -> vector<32x32xf32>
    %c0_45 = arith.constant 0 : index
    %c0_46 = arith.constant 0 : index
    %113 = vector.load %arg9[%c0_45, %c0_46] : memref<1x32xf32, #tpu.memory_space<vmem>>, vector<1x32xf32>
    %114 = vector.broadcast %113 : vector<1x32xf32> to vector<32x32xf32>
    %115 = arith.mulf %112, %114 : vector<32x32xf32>
    %c0_47 = arith.constant 0 : index
    %c0_48 = arith.constant 0 : index
    %116 = vector.load %arg10[%c0_47, %c0_48] : memref<1x32xf32, #tpu.memory_space<vmem>>, vector<1x32xf32>
    %117 = vector.broadcast %116 : vector<1x32xf32> to vector<32x32xf32>
    %118 = arith.addf %115, %117 : vector<32x32xf32>
    %119 = arith.addf %110, %118 : vector<32x32xf32>
    %cst_49 = arith.constant 5.000000e-01 : f32
    %120 = vector.broadcast %cst_49 : f32 to vector<32x32xf32>
    %121 = arith.mulf %120, %119 : vector<32x32xf32>
    %cst_50 = arith.constant 0.707106769 : f32
    %122 = vector.broadcast %cst_50 : f32 to vector<32x32xf32>
    %123 = arith.mulf %119, %122 : vector<32x32xf32>
    %cst_51 = arith.constant 0.000000e+00 : f32
    %124 = vector.broadcast %cst_51 : f32 to vector<32x32xf32>
    %125 = arith.cmpf oge, %123, %124 : vector<32x32xf32>
    %cst_52 = arith.constant 1.000000e+00 : f32
    %cst_53 = arith.constant -1.000000e+00 : f32
    %126 = vector.broadcast %cst_52 : f32 to vector<32x32xf32>
    %127 = vector.broadcast %cst_53 : f32 to vector<32x32xf32>
    %128 = arith.select %125, %126, %127 : vector<32x32xi1>, vector<32x32xf32>
    %129 = math.absf %123 : vector<32x32xf32>
    %cst_54 = arith.constant 0.327591091 : f32
    %130 = vector.broadcast %cst_54 : f32 to vector<32x32xf32>
    %131 = arith.mulf %130, %129 : vector<32x32xf32>
    %cst_55 = arith.constant 1.000000e+00 : f32
    %132 = vector.broadcast %cst_55 : f32 to vector<32x32xf32>
    %133 = arith.addf %132, %131 : vector<32x32xf32>
    %cst_56 = arith.constant 1.000000e+00 : f32
    %134 = vector.broadcast %cst_56 : f32 to vector<32x32xf32>
    %135 = arith.divf %134, %133 : vector<32x32xf32>
    %cst_57 = arith.constant 1.06140542 : f32
    %136 = vector.broadcast %cst_57 : f32 to vector<32x32xf32>
    %137 = arith.mulf %136, %135 : vector<32x32xf32>
    %cst_58 = arith.constant -1.45315206 : f32
    %138 = vector.broadcast %cst_58 : f32 to vector<32x32xf32>
    %139 = arith.addf %137, %138 : vector<32x32xf32>
    %140 = arith.mulf %139, %135 : vector<32x32xf32>
    %cst_59 = arith.constant 1.42141378 : f32
    %141 = vector.broadcast %cst_59 : f32 to vector<32x32xf32>
    %142 = arith.addf %140, %141 : vector<32x32xf32>
    %143 = arith.mulf %142, %135 : vector<32x32xf32>
    %cst_60 = arith.constant -0.284496725 : f32
    %144 = vector.broadcast %cst_60 : f32 to vector<32x32xf32>
    %145 = arith.addf %143, %144 : vector<32x32xf32>
    %146 = arith.mulf %145, %135 : vector<32x32xf32>
    %cst_61 = arith.constant 0.254829586 : f32
    %147 = vector.broadcast %cst_61 : f32 to vector<32x32xf32>
    %148 = arith.addf %146, %147 : vector<32x32xf32>
    %149 = arith.mulf %148, %135 : vector<32x32xf32>
    %cst_62 = arith.constant 0.000000e+00 : f32
    %150 = vector.broadcast %cst_62 : f32 to vector<32x32xf32>
    %151 = arith.subf %150, %129 : vector<32x32xf32>
    %152 = arith.mulf %151, %129 : vector<32x32xf32>
    %153 = math.exp %152 : vector<32x32xf32>
    %154 = arith.mulf %149, %153 : vector<32x32xf32>
    %cst_63 = arith.constant 1.000000e+00 : f32
    %155 = vector.broadcast %cst_63 : f32 to vector<32x32xf32>
    %156 = arith.subf %155, %154 : vector<32x32xf32>
    %157 = arith.mulf %128, %156 : vector<32x32xf32>
    %cst_64 = arith.constant 1.000000e+00 : f32
    %158 = vector.broadcast %cst_64 : f32 to vector<32x32xf32>
    %159 = arith.addf %158, %157 : vector<32x32xf32>
    %160 = arith.mulf %121, %159 : vector<32x32xf32>
    %c0_65 = arith.constant 0 : index
    %c0_66 = arith.constant 0 : index
    %161 = vector.load %arg11[%c0_65, %c0_66] : memref<32x32xf32, #tpu.memory_space<vmem>>, vector<32x32xf32>
    tpu.vector_store %arg11[%c0_65, %c0_66], %160 {strides = array<i32>} : memref<32x32xf32, #tpu.memory_space<vmem>>, vector<32x32xf32>,
    return
  }
  func.func @transform_0(%arg0: i32) -> (i32, i32) {
    %c0_i32 = arith.constant 0 : i32
    %c0_i32_0 = arith.constant 0 : i32
    return %arg0, %c0_i32 : i32, i32
  }
  func.func @transform_1(%arg0: i32) -> (i32, i32) {
    %c0_i32 = arith.constant 0 : i32
    %c0_i32_0 = arith.constant 0 : i32
    %c0_i32_1 = arith.constant 0 : i32
    return %c0_i32, %c0_i32_0 : i32, i32
  }
  func.func @transform_2(%arg0: i32) -> (i32, i32) {
    %c0_i32 = arith.constant 0 : i32
    %c0_i32_0 = arith.constant 0 : i32
    %c0_i32_1 = arith.constant 0 : i32
    return %c0_i32, %c0_i32_0 : i32, i32
  }
  func.func @transform_3(%arg0: i32) -> (i32, i32) {
    %c0_i32 = arith.constant 0 : i32
    %c0_i32_0 = arith.constant 0 : i32
    %c0_i32_1 = arith.constant 0 : i32
    return %c0_i32, %c0_i32_0 : i32, i32
  }
  func.func @transform_4(%arg0: i32) -> (i32, i32) {
    %c0_i32 = arith.constant 0 : i32
    %c0_i32_0 = arith.constant 0 : i32
    %c0_i32_1 = arith.constant 0 : i32
    return %c0_i32, %c0_i32_0 : i32, i32
  }
  func.func @transform_5(%arg0: i32) -> (i32, i32) {
    %c0_i32 = arith.constant 0 : i32
    %c0_i32_0 = arith.constant 0 : i32
    %c0_i32_1 = arith.constant 0 : i32
    return %c0_i32, %c0_i32_0 : i32, i32
  }
  func.func @transform_6(%arg0: i32) -> (i32, i32) {
    %c0_i32 = arith.constant 0 : i32
    %c0_i32_0 = arith.constant 0 : i32
    %c0_i32_1 = arith.constant 0 : i32
    return %c0_i32, %c0_i32_0 : i32, i32
  }
  func.func @transform_7(%arg0: i32) -> (i32, i32) {
    %c0_i32 = arith.constant 0 : i32
    %c0_i32_0 = arith.constant 0 : i32
    %c0_i32_1 = arith.constant 0 : i32
    return %c0_i32, %c0_i32_0 : i32, i32
  }
  func.func @transform_8(%arg0: i32) -> (i32, i32) {
    %c0_i32 = arith.constant 0 : i32
    %c0_i32_0 = arith.constant 0 : i32
    %c0_i32_1 = arith.constant 0 : i32
    return %c0_i32, %c0_i32_0 : i32, i32
  }
  func.func @transform_9(%arg0: i32) -> (i32, i32) {
    %c0_i32 = arith.constant 0 : i32
    %c0_i32_0 = arith.constant 0 : i32
    %c0_i32_1 = arith.constant 0 : i32
    return %c0_i32, %c0_i32_0 : i32, i32
  }
  func.func @transform_10(%arg0: i32) -> (i32, i32) {
    %c0_i32 = arith.constant 0 : i32
    %c0_i32_0 = arith.constant 0 : i32
    return %arg0, %c0_i32 : i32, i32
  }
}

</mosaic_0001>

<bundles_post_ra>
// kernel: residual_block_forward.1
= control target key start
LH: loop header
LB: loop body
LE: loop exit
PB: predicated region body
PF: predicated region fallthrough
CT: control target
= control target key end

     0   :  { %v40_v3 = vlaneseq  ;;  %s1053_s19 = smov 4   ;;  %s1406_s0 = inlined_call_operand.vmem [shape: f32[32,4], index: 0, kind: input, shape index: {}]   ;;  %s1407_s1 = inlined_call_operand.vmem [shape: f32[12,32], index: 1, kind: input, shape index: {}]   ;;  %s1408_s2 = inlined_call_operand.vmem [shape: f32[1,32], index: 2, kind: input, shape index: {}]   ;;  %s1409_s3 = inlined_call_operand.vmem [shape: f32[1,32], index: 3, kind: input, shape index: {}]   ;;  %s1410_s4 = inlined_call_operand.vmem [shape: f32[96,32], index: 4, kind: input, shape index: {}]   ;;  %s1411_s5 = inlined_call_operand.vmem [shape: f32[1,32], index: 5, kind: input, shape index: {}]   ;;  %s1412_s6 = inlined_call_operand.vmem [shape: f32[1,32], index: 6, kind: input, shape index: {}]   ;;  %s1413_s7 = inlined_call_operand.vmem [shape: f32[4,32], index: 7, kind: input, shape index: {}]   ;;  %s1414_s8 = inlined_call_operand.vmem [shape: f32[1,32], index: 8, kind: input, shape index: {}]   ;;  %s1415_s9 = inlined_call_operand.vmem [shape: f32[1,32], index: 9, kind: input, shape index: {}]   ;;  %s1416_s10 = inlined_call_operand.hbm [shape: f32[32,32], index: 10, kind: output, shape index: {}]  }
   0x1   :  { %v1119_v0 = vld [vmem:[%s1406_s0 + $0x18] sm:$0xff]  ;;  %v1124_v1 = vld [vmem:[%s1406_s0] sm:$0xff]  ;;  %v1129_v2 = vld [vmem:[%s1406_s0 + $0x8] sm:$0xff] }
   0x2   :  { %177 = vrot.lane.b32.xlu1 %v1119_v0, %s1053_s19  ;;  %171 = vrot.lane.b32.xlu0 %v1124_v1, %s1053_s19  ;;  %v154_v4 = vrot.slane %v1124_v1, 2  ;;  %v1134_v5 = vshrl.u32 %v40_v3, 7  ;;  %v155_v6 = vrot.slane %v1129_v2, 2  ;;  %v1140_v7 = vld [vmem:[%s1406_s0 + $0x10] sm:$0xff] }
   0x3   :  { %15 = vsyncpa [#allocation3], 0  ;;  %v156_v11 = vrot.slane %v1140_v7, 2  ;;  %v157_v12 = vrot.slane %v1119_v0, 2  ;;  %s1054_s22 = smov 8   ;;  %vm224_vm1 = vcmask 1043456  }
   0x4   :  { %vm158_vm0 = vcmp.lt.s32.totalorder %v1134_v5, 6  ;;  %v42_v8 = vadd.s32 8, %v1134_v5  ;;  %v44_v9 = vadd.s32 24, %v1134_v5  ;;  %v49_v15 = vand.u32 15, %v1134_v5  ;;  %v210_v16 = vld [vmem:[%s1407_s1 + $0x8] sm:$0xf] }
   0x5   :  { %v161_v10 = vsel %vm158_vm0, %v154_v4, %v155_v6  ;;  %v43_v17 = vadd.s32 16, %v1134_v5  ;;  %v209_v21 = vld [vmem:[%s1407_s1] sm:$0xff]  ;;  %v159_v22 = vsel %vm158_vm0, %v156_v11, %v157_v12  ;;  %v160_v23 = vsel %vm158_vm0, %v155_v6, %v156_v11  ;;  %943 = vmatprep.subr.msk.mxu0 %vm224_vm1, %v210_v16  ;;  %v520_v60 = vld [vmem:[%s1410_s4 + $0x58] sm:$0xff]  ;;  %v519_v61 = vld [vmem:[%s1410_s4 + $0x50] sm:$0xff]  ;;  %s1057_s11 = smov 32  }
   0x6   :  { %173 = vrot.lane.b32.xlu0 %v1129_v2, %s1053_s19  ;;  %187 = vrot.lane.b32.xlu1 %v161_v10, %s1054_s22  ;;  %v56_v13 = vand.u32 15, %v42_v8  ;;  %v70_v14 = vand.u32 15, %v44_v9  ;;  %v93_v20 = vadd.s32 4294967294, %v49_v15  ;;  %v162_v25 = vsel %vm158_vm0, %v157_v12, %v154_v4  ;;  %v518_v62 = vld [vmem:[%s1410_s4 + $0x48] sm:$0xff]  ;;  %v517_v63 = vld [vmem:[%s1410_s4 + $0x40] sm:$0xff] }
   0x7   :  { %v63_v24 = vand.u32 15, %v43_v17  ;;  %944 = vmatpush3.msk.msra.mxu0 %vm224_vm1, %v210_v16  ;;  %v1055_v26 = vmov 0.0   ;;  %v144_v34 = vrot.slane %v1119_v0, 6  ;;  %v141_v35 = vrot.slane %v1124_v1, 6  ;;  %953 = vmatprep.subr.mxu1 %v520_v60  ;;  %v515_v3 = vld [vmem:[%s1410_s4 + $0x30] sm:$0xff] }
   0x8   :  { %v118_v18 = vadd.s32 2, %v56_v13  ;;  %v120_v19 = vadd.s32 2, %v70_v14  ;;  %vm97_vm4 = vcmp.ge.s32.totalorder %v93_v20, 0  ;;  %945 = vmatprep.subr.mxu0 %v209_v21  ;;  %vm145_vm6 = vcmp.lt.s32.totalorder %v1134_v5, 2  ;;  %954 = vmatpush3.msra.mxu1 %v520_v60  ;;  %v901_v4 = vld [vmem:[%s1408_s2] ss:$0 sm:$0xff] }
   0x9   :  { %v1172_v29 = vsel %vm97_vm4, 1.0, %v1055_v26  ;;  %v95_v30 = vadd.s32 4294967294, %v63_v24  ;;  %946 = vmatpush3.msra.mxu0 %v209_v21  ;;  %v149_v36 = vsel %vm145_vm6, %v144_v34, %v141_v35  ;;  %vm199_vm7 = vcmask 31744   ;;  %955 = vmatprep.subr.mxu1 %v519_v61  ;;  %v902_v8 = vld [vmem:[%s1409_s3] ss:$0 sm:$0xff] }
   0xa   :  { %175 = vrot.lane.b32.xlu0 %v1140_v7, %s1053_s19  ;;  %vm126_vm2 = vcmp.lt.s32.totalorder %v118_v18, 16  ;;  %vm128_vm3 = vcmp.lt.s32.totalorder %v120_v19, 16  ;;  %v150_v37 = vmul.f32 %v1172_v29, %v149_v36  ;;  %v142_v40 = vrot.slane %v1129_v2, 6  ;;  %956 = vmatpush3.msra.mxu1 %v519_v61 }
   0xb   :  { %v1168_v27 = vsel %vm126_vm2, 1.0, %v1055_v26  ;;  %v1170_v28 = vsel %vm128_vm3, 1.0, %v1055_v26  ;;  %vm99_vm5 = vcmp.ge.s32.totalorder %v95_v30, 0  ;;  %v143_v41 = vrot.slane %v1140_v7, 6  ;;  %957 = vmatprep.subr.mxu1 %v518_v62 }
   0xc   :  { %v164_v31 = vmul.f32 %v1168_v27, %v160_v23  ;;  %v166_v32 = vmul.f32 %v1170_v28, %v162_v25  ;;  %v1178_v33 = vsel %vm99_vm5, 1.0, %v1055_v26  ;;  %vm204_vm8 = vcmask 64512   ;;  %958 = vmatpush3.msra.mxu1 %v518_v62 }
   0xd   :  { %v147_v43 = vsel %vm145_vm6, %v142_v40, %v143_v41  ;;  %vm211_vm9 = vcmask 97280   ;;  %v148_v49 = vsel %vm145_vm6, %v141_v35, %v142_v40  ;;  %v146_v55 = vsel %vm145_vm6, %v143_v41, %v144_v34  ;;  %959 = vmatprep.subr.mxu1 %v517_v63 }
   0xe   :  { %191 = vrot.lane.b32.xlu0 %v159_v22, %s1054_s22  ;;  %189 = vrot.lane.b32.xlu1 %v164_v31, %s1054_s22  ;;  %v152_v47 = vmul.f32 %v1178_v33, %v147_v43  ;;  %vm504_vm14 = vcmask 523264   ;;  %vm499_vm15 = vcmask 261120  }
   0xf   :  { %960 = vmatpush3.msra.mxu1 %v517_v63 }
  0x12   :  { %193 = vrot.lane.b32.xlu1 %v166_v32, %s1054_s22 }
  0x74   :  { %v178_v38 = vpop.permute.xlu1 %177  ;;  %v172_v39 = vpop.permute.xlu0 %171 }
  0x75   :  { %v200_v42 = vsel %vm199_vm7, %v150_v37, %v172_v39  ;;  %v203_v57 = vsel %vm199_vm7, %v146_v55, %v178_v38 }
  0x78   :  { %v174_v44 = vpop.permute.xlu0 %173  ;;  %v188_v45 = vpop.permute.xlu1 %187 }
  0x79   :  { %v205_v46 = vsel %vm204_vm8, %v200_v42, %v188_v45  ;;  %v201_v52 = vsel %vm199_vm7, %v148_v49, %v174_v44 }
  0x7a   :  { %947 = vmatprep.mubr.msk.f32.mxu0 %vm211_vm9, %v205_v46 }
  0x7c   :  { %v176_v48 = vpop.permute.xlu0 %175 }
  0x7d   :  { %v202_v50 = vsel %vm199_vm7, %v152_v47, %v176_v48 }
  0x80   :  { %v192_v51 = vpop.permute.xlu0 %191  ;;  %v190_v54 = vpop.permute.xlu1 %189 }
  0x81   :  { %v207_v53 = vsel %vm204_vm8, %v202_v50, %v192_v51  ;;  %v206_v56 = vsel %vm204_vm8, %v201_v52, %v190_v54 }
  0x82   :  { %948 = vmatmul.mubr.msk.f32.vlgmr.msra.gmra.mxu0 %vm211_vm9, %v206_v56 }
  0x83   :  { %950 = vmatprep.mubr.msk.f32.mxu0 %vm211_vm9, %v207_v53 }
  0x84   :  { %v194_v58 = vpop.permute.xlu1 %193 }
  0x85   :  { %v208_v59 = vsel %vm204_vm8, %v203_v57, %v194_v58 }
  0x86   :  { %951 = vmatmul.mubr.msk.f32.gmra.mxu0 %vm211_vm9, %v208_v59 }
  0x87   :  { %985 = vmatprep.mubr.msk.f32.mxu0 %vm199_vm7, %v1124_v1  ;;  %v516_v1 = vld [vmem:[%s1410_s4 + $0x38] sm:$0xff] }
  0x88   :  { %961 = vmatprep.subr.mxu1 %v516_v1 }
  0x89   :  { %962 = vmatpush3.msra.mxu1 %v516_v1 }
  0x8a   :  { %963 = vmatprep.subr.mxu1 %v515_v3 }
  0x8b   :  { %964 = vmatpush3.msra.mxu1 %v515_v3 }
 0x142   :  { %v949_v6 = vpop.f32.mrf.mxu0 }
 0x143   :  { %v321_v9 = vmul.f32 %v949_v6, %v901_v4 }
 0x144   :  { %v294_v10 = vpop.f32.mrf.mxu0 }
 0x145   :  { %v1234_v11 = vadd.f32 %v902_v8, %v321_v9  ;;  %v320_v12 = vmul.f32 %v901_v4, %v294_v10 }
 0x146   :  { %v952_v13 = vpop.f32.mrf.mxu0 }
 0x147   :  { %v1237_v14 = vmul.f32 0.70710677, %v1234_v11  ;;  %v1239_v15 = vadd.f32 %v902_v8, %v320_v12  ;;  %v323_v16 = vmul.f32 %v952_v13, %v901_v4 }
 0x148   :  { %v304_v17 = vpop.f32.mrf.mxu0 }
 0x149   :  { %v352_v18 = vand.u32 2147483647, %v1237_v14  ;;  %v1243_v19 = vmul.f32 0.70710677, %v1239_v15  ;;  %v1245_v20 = vadd.f32 %v902_v8, %v323_v16  ;;  %v322_v21 = vmul.f32 %v901_v4, %v304_v17 }
 0x14a   :  { %vm344_vm10 = vcmp.ge.f32.partialorder %v1237_v14, 0.0 }
 0x14b   :  { %v356_v22 = vmul.f32 0.3275911, %v352_v18  ;;  %v351_v23 = vand.u32 2147483647, %v1243_v19  ;;  %v1249_v24 = vmul.f32 0.70710677, %v1245_v20  ;;  %v1251_v25 = vadd.f32 %v902_v8, %v322_v21 }
 0x14c   :  { %v408_v40 = vsub.f32 0.0, %v352_v18  ;;  %vm343_vm11 = vcmp.ge.f32.partialorder %v1243_v19, 0.0  ;;  %v509_v19 = vld [vmem:[%s1410_s4] sm:$0xff] }
 0x14d   :  { %v360_v26 = vadd.f32 1.0, %v356_v22  ;;  %v355_v30 = vmul.f32 0.3275911, %v351_v23  ;;  %v354_v31 = vand.u32 2147483647, %v1249_v24  ;;  %v407_v41 = vsub.f32 0.0, %v351_v23 }
 0x14e   :  { %v1255_v32 = vmul.f32 0.70710677, %v1251_v25  ;;  %v412_v42 = vmul.f32 %v408_v40, %v352_v18  ;;  %vm346_vm12 = vcmp.ge.f32.partialorder %v1249_v24, 0.0 }
 0x14f   :  { %999 = vrcp.f32 %v360_v26  ;;  %v359_v34 = vadd.f32 1.0, %v355_v30  ;;  %v358_v35 = vmul.f32 0.3275911, %v354_v31  ;;  %v410_v43 = vsub.f32 0.0, %v354_v31 }
 0x150   :  { %v353_v36 = vand.u32 2147483647, %v1255_v32  ;;  %v411_v45 = vmul.f32 %v407_v41, %v351_v23  ;;  %v417_v46 = vmul.f32 1.442695, %v412_v42  ;;  %v513_v41 = vld [vmem:[%s1410_s4 + $0x20] sm:$0xff]  ;;  %vm345_vm13 = vcmp.ge.f32.partialorder %v1255_v32, 0.0 }
 0x151   :  { %1001 = vrcp.f32 %v359_v34  ;;  %v362_v37 = vadd.f32 1.0, %v358_v35  ;;  %v414_v49 = vmul.f32 %v410_v43, %v354_v31  ;;  %v514_v31 = vld [vmem:[%s1410_s4 + $0x28] sm:$0xff]  ;;  %v641_v42 = vld [vmem:[%s1413_s7] sm:$0xf] }
 0x152   :  { %v357_v38 = vmul.f32 0.3275911, %v353_v36  ;;  %v409_v47 = vsub.f32 0.0, %v353_v36  ;;  %v415_v52 = vmul.f32 1.442695, %v411_v45  ;;  %965 = vmatprep.subr.mxu1 %v514_v31  ;;  %983 = vmatprep.subr.msk.mxu0 %vm224_vm1, %v641_v42 }
 0x153   :  { %1003 = vrcp.f32 %v362_v37  ;;  %v421_v57 = vmul.f32 1.442695, %v414_v49  ;;  %966 = vmatpush3.msra.mxu1 %v514_v31  ;;  %984 = vmatpush3.msk.msra.mxu0 %vm224_vm1, %v641_v42  ;;  %v1056_v49 = vmov -1.0   ;;  %vm521_vm1 = vcmask 785408  }
 0x154   :  { %v361_v39 = vadd.f32 1.0, %v357_v38  ;;  %v413_v55 = vmul.f32 %v409_v47, %v353_v36  ;;  %967 = vmatprep.subr.mxu1 %v513_v41  ;;  %986 = vmatmul.mubr.msk.f32.vlgmr.msra.gmra.mxu0 %vm199_vm7, %v1129_v2  ;;  %v347_v2 = vsel %vm343_vm11, 1.0, %v1056_v49 }
 0x155   :  { %968 = vmatpush3.msra.mxu1 %v513_v41  ;;  %988 = vmatprep.mubr.msk.f32.mxu0 %vm199_vm7, %v1140_v7 }
 0x156   :  { %1005 = vrcp.f32 %v361_v39  ;;  %v419_v1 = vmul.f32 1.442695, %v413_v55 }
 0x157   :  { %1007 = vpow2.f32 %v417_v46 }
 0x158   :  { %1009 = vpow2.f32 %v415_v52  ;;  %989 = vmatmul.mubr.msk.f32.gmra.mxu0 %vm199_vm7, %v1119_v0 }
 0x159   :  { %1011 = vpow2.f32 %v421_v57 }
 0x15a   :  { %1013 = vpow2.f32 %v419_v1 }
 0x15c   :  { %v1000_v44 = vpop.eup %999 }
 0x15d   :  { %v372_v48 = vmul.f32 1.0614054, %v1000_v44 }
 0x15e   :  { %v1002_v50 = vpop.eup %1001 }
 0x15f   :  { %v376_v51 = vadd.f32 -1.4531521, %v372_v48  ;;  %v371_v53 = vmul.f32 1.0614054, %v1002_v50  ;;  %v512_v48 = vld [vmem:[%s1410_s4 + $0x18] sm:$0xff] }
 0x160   :  { %v1004_v54 = vpop.eup %1003  ;;  %969 = vmatprep.subr.mxu1 %v512_v48 }
 0x161   :  { %v380_v56 = vmul.f32 %v1000_v44, %v376_v51  ;;  %v375_v58 = vadd.f32 -1.4531521, %v371_v53  ;;  %v374_v59 = vmul.f32 1.0614054, %v1004_v54  ;;  %v511_v53 = vld [vmem:[%s1410_s4 + $0x10] sm:$0xff]  ;;  %970 = vmatpush3.msra.mxu1 %v512_v48 }
 0x162   :  { %971 = vmatprep.subr.mxu1 %v511_v53 }
 0x163   :  { %v384_v60 = vadd.f32 1.4214138, %v380_v56  ;;  %v1258_v61 = vpop.eup %1005  ;;  %v379_v62 = vmul.f32 %v1002_v50, %v375_v58  ;;  %v378_v63 = vadd.f32 -1.4531521, %v374_v59  ;;  %v336_v59 = vmul.f32 0.5, %v1234_v11  ;;  %972 = vmatpush3.msra.mxu1 %v511_v53 }
 0x164   :  { %v373_v4 = vmul.f32 1.0614054, %v1258_v61  ;;  %v1008_v36 = vpop.eup %1007  ;;  %v350_v11 = vsel %vm346_vm12, 1.0, %v1056_v49 }
 0x165   :  { %v388_v3 = vmul.f32 %v1000_v44, %v384_v60  ;;  %v383_v6 = vadd.f32 1.4214138, %v379_v62  ;;  %v382_v8 = vmul.f32 %v1004_v54, %v378_v63  ;;  %v1010_v45 = vpop.eup %1009 }
 0x166   :  { %v377_v10 = vadd.f32 -1.4531521, %v373_v4  ;;  %v1012_v55 = vpop.eup %1011 }
 0x167   :  { %v392_v9 = vadd.f32 -0.28449672, %v388_v3  ;;  %v387_v12 = vmul.f32 %v1002_v50, %v383_v6  ;;  %v386_v13 = vadd.f32 1.4214138, %v382_v8  ;;  %v1014_v7 = vpop.eup %1013 }
 0x168   :  { %v381_v17 = vmul.f32 %v1258_v61, %v377_v10 }
 0x169   :  { %v396_v16 = vmul.f32 %v1000_v44, %v392_v9  ;;  %v391_v18 = vadd.f32 -0.28449672, %v387_v12  ;;  %v390_v21 = vmul.f32 %v1004_v54, %v386_v13  ;;  %v338_v9 = vmul.f32 0.5, %v1245_v20 }
 0x16a   :  { %v385_v23 = vadd.f32 1.4214138, %v381_v17  ;;  %v349_v12 = vsel %vm345_vm13, 1.0, %v1056_v49 }
 0x16b   :  { %v400_v22 = vadd.f32 0.2548296, %v396_v16  ;;  %v395_v26 = vmul.f32 %v1002_v50, %v391_v18  ;;  %v394_v30 = vadd.f32 -0.28449672, %v390_v21 }
 0x16c   :  { %v389_v35 = vmul.f32 %v1258_v61, %v385_v23 }
 0x16d   :  { %v404_v34 = vmul.f32 %v1000_v44, %v400_v22  ;;  %v399_v37 = vadd.f32 0.2548296, %v395_v26  ;;  %v398_v38 = vmul.f32 %v1004_v54, %v394_v30  ;;  %v337_v22 = vmul.f32 0.5, %v1251_v25 }
 0x16e   :  { %v393_v40 = vadd.f32 -0.28449672, %v389_v35 }
 0x16f   :  { %v424_v39 = vmul.f32 %v1008_v36, %v404_v34  ;;  %v403_v43 = vmul.f32 %v1002_v50, %v399_v37  ;;  %v402_v44 = vadd.f32 0.2548296, %v398_v38  ;;  %v348_v50 = vsel %vm344_vm10, 1.0, %v1056_v49 }
 0x170   :  { %v397_v47 = vmul.f32 %v1258_v61, %v393_v40 }
 0x171   :  { %v428_v46 = vsub.f32 1.0, %v424_v39  ;;  %v423_v51 = vmul.f32 %v1010_v45, %v403_v43  ;;  %v406_v52 = vmul.f32 %v1004_v54, %v402_v44  ;;  %v510_v54 = vld [vmem:[%s1410_s4 + $0x8] sm:$0xff]  ;;  %s1058_s4 = smov 64  }
 0x172   :  { %v401_v57 = vadd.f32 0.2548296, %v397_v47  ;;  %973 = vmatprep.subr.mxu1 %v510_v54 }
 0x173   :  { %v432_v56 = vmul.f32 %v428_v46, %v348_v50  ;;  %v427_v14 = vsub.f32 1.0, %v423_v51  ;;  %v426_v58 = vmul.f32 %v1012_v55, %v406_v52  ;;  %974 = vmatpush3.msra.mxu1 %v510_v54 }
 0x174   :  { %v405_v62 = vmul.f32 %v1258_v61, %v401_v57  ;;  %v335_v61 = vmul.f32 0.5, %v1239_v15  ;;  %975 = vmatprep.subr.mxu1 %v509_v19 }
 0x175   :  { %v436_v60 = vadd.f32 1.0, %v432_v56  ;;  %v431_v63 = vmul.f32 %v427_v14, %v347_v2  ;;  %v430_v1 = vsub.f32 1.0, %v426_v58  ;;  %976 = vmatpush3.msra.mxu1 %v509_v19  ;;  %v914_v58 = vld [vmem:[%s1414_s8] ss:$0 sm:$0xff] }
 0x176   :  { %v425_v4 = vmul.f32 %v1014_v7, %v405_v62  ;;  %v907_v2 = vld [vmem:[%s1411_s5] ss:$0 sm:$0xff]  ;;  %s1059_s5 = smov [#allocation2]  }
 0x177   :  { %v440_v3 = vmul.f32 %v436_v60, %v336_v59  ;;  %v435_v6 = vadd.f32 1.0, %v431_v63  ;;  %v434_v8 = vmul.f32 %v430_v1, %v350_v11  ;;  %v915_v60 = vld [vmem:[%s1415_s9] ss:$0 sm:$0xff] }
 0x178   :  { %v429_v0 = vsub.f32 1.0, %v425_v4  ;;  %v908_v63 = vld [vmem:[%s1412_s6] ss:$0 sm:$0xff]  ;;  %s881_s6 = sshll.u32 %s1059_s5, 4  ;;  %s882_s6 = int_to_ptr.vmem [resolvable:$true] %s881_s6 }
 0x179   :  { %473 = vrot.lane.b32.xlu1 %v440_v3, %s1057_s11  ;;  %v439_v24 = vmul.f32 %v435_v6, %v335_v61  ;;  %v438_v10 = vadd.f32 1.0, %v434_v8  ;;  %v456_v13 = vrot.slane %v440_v3, 2  ;;  %v444_v21 = vrot.slane %v440_v3, 6  ;;  %s1031_s8 = scalar_lea.vmem %s882_s6, 512  ;;  %p1036_p1 = scmp.lt.s32.totalorder %s882_s6, %s882_s6 }
 0x17a   :  { %v433_v16 = vmul.f32 %v429_v0, %v349_v12  ;;  %p1032_p0 = scmp.ne.s32.totalorder %s882_s6, %s1031_s8  ;;  %p1037_p2 = scmp.lt.s32.totalorder %s1031_s8, %s1031_s8 }
 0x17b   :  { %471 = vrot.lane.b32.xlu0 %v439_v24, %s1057_s11  ;;  %v442_v15 = vmul.f32 %v438_v10, %v338_v9  ;;  %v455_v17 = vrot.slane %v439_v24, 2  ;;  %v443_v18 = vrot.slane %v439_v24, 6 }
 0x17c   :  { %v437_v23 = vadd.f32 1.0, %v433_v16  ;;  %p1038_p3 = por %p1037_p2, %p1036_p1 }
 0x17d   :  { %477 = vrot.lane.b32.xlu1 %v442_v15, %s1057_s11  ;;  %v446_v20 = vrot.slane %v442_v15, 6  ;;  %v461_v26 = vsel %vm158_vm0, %v455_v17, %v456_v13  ;;  %v449_v32 = vsel %vm145_vm6, %v443_v18, %v444_v21  ;;  %v458_v35 = vrot.slane %v442_v15, 2 }
 0x17e   :  { %v441_v30 = vmul.f32 %v437_v23, %v337_v22  ;;  %p1039_p4 = pnand %p1038_p3, %p1032_p0 }
 0x17f   :  { %487 = vrot.lane.b32.xlu0 %v461_v26, %s1058_s4  ;;  %v450_v31 = vsel %vm145_vm6, %v446_v20, %v443_v18  ;;  %v462_v40 = vsel %vm158_vm0, %v458_v35, %v455_v17 }
 0x180   :  { %v457_v34 = vrot.slane %v441_v30, 2  ;;  %v445_v36 = vrot.slane %v441_v30, 6  ;;  %v466_v42 = vmul.f32 %v1170_v28, %v462_v40  ;;  %v451_v45 = vmul.f32 %v1172_v29, %v450_v31 }
 0x182   :  { %v460_v25 = vsel %vm158_vm0, %v456_v13, %v457_v34  ;;  %v447_v37 = vsel %vm145_vm6, %v445_v36, %v446_v20  ;;  %v448_v38 = vsel %vm145_vm6, %v444_v21, %v445_v36  ;;  %v459_v41 = vsel %vm158_vm0, %v457_v34, %v458_v35 }
 0x183   :  { %475 = vrot.lane.b32.xlu0 %v441_v30, %s1057_s11  ;;  %v464_v39 = vmul.f32 %v1168_v27, %v460_v25  ;;  %v453_v28 = vmul.f32 %v1178_v33, %v448_v38 }
 0x185   :  { %489 = vrot.lane.b32.xlu1 %v464_v39, %s1058_s4 }
 0x187   :  { %491 = vrot.lane.b32.xlu0 %v459_v41, %s1058_s4 }
 0x189   :  { %493 = vrot.lane.b32.xlu1 %v466_v42, %s1058_s4 }
 0x1eb   :  { %v474_v43 = vpop.permute.xlu1 %473 }
 0x1ec   :  { %v501_v50 = vsel %vm499_vm15, %v449_v32, %v474_v43 }
 0x1ed   :  { %v472_v44 = vpop.permute.xlu0 %471 }
 0x1ee   :  { %v500_v27 = vsel %vm499_vm15, %v451_v45, %v472_v44 }
 0x1ef   :  { %v478_v48 = vpop.permute.xlu1 %477 }
 0x1f0   :  { %v503_v56 = vsel %vm499_vm15, %v447_v37, %v478_v48 }
 0x1f1   :  { %v488_v46 = vpop.permute.xlu0 %487 }
 0x1f2   :  { %v505_v47 = vsel %vm504_vm14, %v500_v27, %v488_v46 }
 0x1f3   :  { %977 = vmatprep.mubr.msk.f32.mxu1 %vm521_vm1, %v505_v47 }
 0x1f5   :  { %v476_v5 = vpop.permute.xlu0 %475 }
 0x1f6   :  { %v502_v29 = vsel %vm499_vm15, %v453_v28, %v476_v5 }
 0x1f7   :  { %v490_v51 = vpop.permute.xlu1 %489 }
 0x1f8   :  { %v506_v52 = vsel %vm504_vm14, %v501_v50, %v490_v51 }
 0x1f9   :  { %978 = vmatmul.mubr.msk.f32.vlgmr.msra.gmra.mxu1 %vm521_vm1, %v506_v52  ;;  %v492_v53 = vpop.permute.xlu0 %491 }
 0x1fa   :  { %v507_v55 = vsel %vm504_vm14, %v502_v29, %v492_v53 }
 0x1fb   :  { %v494_v57 = vpop.permute.xlu1 %493  ;;  %980 = vmatprep.mubr.msk.f32.mxu1 %vm521_vm1, %v507_v55 }
 0x1fc   :  { %v508_v14 = vsel %vm504_vm14, %v503_v56, %v494_v57 }
 0x1fd   :  { %981 = vmatmul.mubr.msk.f32.gmra.mxu1 %vm521_vm1, %v508_v14 }
 0x214   :  { %v987_v33 = vpop.f32.mrf.mxu0 }
 0x215   :  { %v746_v59 = vmul.f32 %v987_v33, %v914_v58 }
 0x216   :  { %v719_v54 = vpop.f32.mrf.mxu0 }
 0x217   :  { %v757_v1 = vadd.f32 %v915_v60, %v746_v59  ;;  %v745_v11 = vmul.f32 %v914_v58, %v719_v54 }
 0x218   :  { %v990_v62 = vpop.f32.mrf.mxu0 }
 0x219   :  { %v748_v19 = vmul.f32 %v990_v62, %v914_v58  ;;  %v756_v24 = vadd.f32 %v915_v60, %v745_v11 }
 0x21a   :  { %v729_v8 = vpop.f32.mrf.mxu0 }
 0x21b   :  { %v759_v13 = vadd.f32 %v915_v60, %v748_v19  ;;  %v747_v16 = vmul.f32 %v914_v58, %v729_v8 }
 0x21d   :  { %v758_v32 = vadd.f32 %v915_v60, %v747_v16 }
 0x2b9   :  { %v979_v7 = vpop.f32.mrf.mxu1 }
 0x2ba   :  { %v627_v3 = vmul.f32 %v979_v7, %v907_v2 }
 0x2bb   :  { %v600_v4 = vpop.f32.mrf.mxu1 }
 0x2bc   :  { %v638_v61 = vadd.f32 %v908_v63, %v627_v3  ;;  %v626_v6 = vmul.f32 %v907_v2, %v600_v4 }
 0x2bd   :  { %v982_v0 = vpop.f32.mrf.mxu1 }
 0x2be   :  { %v1362_v9 = vadd.f32 %v757_v1, %v638_v61  ;;  %v637_v10 = vadd.f32 %v908_v63, %v626_v6  ;;  %v629_v12 = vmul.f32 %v982_v0, %v907_v2 }
 0x2bf   :  { %v610_v15 = vpop.f32.mrf.mxu1 }
 0x2c0   :  { %v1365_v17 = vmul.f32 0.70710677, %v1362_v9  ;;  %v1367_v18 = vadd.f32 %v756_v24, %v637_v10  ;;  %v640_v21 = vadd.f32 %v908_v63, %v629_v12  ;;  %v628_v22 = vmul.f32 %v907_v2, %v610_v15 }
 0x2c2   :  { %v781_v23 = vand.u32 2147483647, %v1365_v17  ;;  %v1371_v20 = vmul.f32 0.70710677, %v1367_v18  ;;  %v1373_v26 = vadd.f32 %v759_v13, %v640_v21  ;;  %v639_v30 = vadd.f32 %v908_v63, %v628_v22 }
 0x2c3   :  { %vm773_vm0 = vcmp.ge.f32.partialorder %v1365_v17, 0.0 }
 0x2c4   :  { %v785_v31 = vmul.f32 0.3275911, %v781_v23  ;;  %v780_v34 = vand.u32 2147483647, %v1371_v20  ;;  %v1377_v35 = vmul.f32 0.70710677, %v1373_v26  ;;  %v1379_v36 = vadd.f32 %v758_v32, %v639_v30 }
 0x2c5   :  { %v837_v45 = vsub.f32 0.0, %v781_v23  ;;  %vm772_vm2 = vcmp.ge.f32.partialorder %v1371_v20, 0.0 }
 0x2c6   :  { %v789_v25 = vadd.f32 1.0, %v785_v31  ;;  %v784_v37 = vmul.f32 0.3275911, %v780_v34  ;;  %v783_v38 = vand.u32 2147483647, %v1377_v35  ;;  %v836_v46 = vsub.f32 0.0, %v780_v34 }
 0x2c7   :  { %v1383_v39 = vmul.f32 0.70710677, %v1379_v36  ;;  %v841_v47 = vmul.f32 %v837_v45, %v781_v23  ;;  %vm775_vm3 = vcmp.ge.f32.partialorder %v1377_v35, 0.0 }
 0x2c8   :  { %1015 = vrcp.f32 %v789_v25  ;;  %v788_v40 = vadd.f32 1.0, %v784_v37  ;;  %v787_v41 = vmul.f32 0.3275911, %v783_v38  ;;  %v839_v48 = vsub.f32 0.0, %v783_v38 }
 0x2c9   :  { %v782_v42 = vand.u32 2147483647, %v1383_v39  ;;  %v840_v50 = vmul.f32 %v836_v46, %v780_v34  ;;  %v846_v51 = vmul.f32 1.442695, %v841_v47  ;;  %v779_v20 = vsel %vm775_vm3, 1.0, %v1056_v49 }
 0x2ca   :  { %1017 = vrcp.f32 %v788_v40  ;;  %v791_v43 = vadd.f32 1.0, %v787_v41  ;;  %v843_v29 = vmul.f32 %v839_v48, %v783_v38  ;;  %vm774_vm4 = vcmp.ge.f32.partialorder %v1383_v39, 0.0 }
 0x2cb   :  { %v786_v44 = vmul.f32 0.3275911, %v782_v42  ;;  %v838_v52 = vsub.f32 0.0, %v782_v42  ;;  %v844_v57 = vmul.f32 1.442695, %v840_v50  ;;  %v765_v50 = vmul.f32 0.5, %v1362_v9 }
 0x2cc   :  { %1019 = vrcp.f32 %v791_v43  ;;  %v850_v60 = vmul.f32 1.442695, %v843_v29  ;;  %v766_v39 = vmul.f32 0.5, %v1379_v36 }
 0x2cd   :  { %v790_v27 = vadd.f32 1.0, %v786_v44  ;;  %v842_v58 = vmul.f32 %v838_v52, %v782_v42  ;;  %v777_v44 = vsel %vm773_vm0, 1.0, %v1056_v49 }
 0x2cf   :  { %1021 = vrcp.f32 %v790_v27  ;;  %v848_v11 = vmul.f32 1.442695, %v842_v58 }
 0x2d0   :  { %1023 = vpow2.f32 %v846_v51  ;;  %v776_v51 = vsel %vm772_vm2, 1.0, %v1056_v49 }
 0x2d1   :  { %1025 = vpow2.f32 %v844_v57 }
 0x2d2   :  { %1027 = vpow2.f32 %v850_v60  ;;  %v778_v60 = vsel %vm774_vm4, 1.0, %v1056_v49 }
 0x2d3   :  { %1029 = vpow2.f32 %v848_v11 }
 0x2d5   :  { %v1016_v5 = vpop.eup %1015 }
 0x2d6   :  { %v801_v28 = vmul.f32 1.0614054, %v1016_v5 }
 0x2d7   :  { %v1018_v53 = vpop.eup %1017 }
 0x2d8   :  { %v805_v55 = vadd.f32 -1.4531521, %v801_v28  ;;  %v800_v56 = vmul.f32 1.0614054, %v1018_v53 }
 0x2d9   :  { %v1020_v14 = vpop.eup %1019 }
 0x2da   :  { %v809_v33 = vmul.f32 %v1016_v5, %v805_v55  ;;  %v804_v54 = vadd.f32 -1.4531521, %v800_v56  ;;  %v803_v59 = vmul.f32 1.0614054, %v1020_v14 }
 0x2dc   :  { %v813_v2 = vadd.f32 1.4214138, %v809_v33  ;;  %v1022_v62 = vpop.eup %1021  ;;  %v808_v7 = vmul.f32 %v1018_v53, %v804_v54  ;;  %v807_v63 = vadd.f32 -1.4531521, %v803_v59  ;;  %v767_v54 = vmul.f32 0.5, %v1373_v26 }
 0x2dd   :  { %v802_v3 = vmul.f32 1.0614054, %v1022_v62  ;;  %v1024_v30 = vpop.eup %1023 }
 0x2de   :  { %v817_v1 = vmul.f32 %v1016_v5, %v813_v2  ;;  %v812_v4 = vadd.f32 1.4214138, %v808_v7  ;;  %v811_v19 = vmul.f32 %v1020_v14, %v807_v63  ;;  %v1026_v41 = vpop.eup %1025 }
 0x2df   :  { %v806_v6 = vadd.f32 -1.4531521, %v802_v3  ;;  %v1028_v46 = vpop.eup %1027 }
 0x2e0   :  { %v821_v61 = vadd.f32 -0.28449672, %v817_v1  ;;  %v816_v8 = vmul.f32 %v1018_v53, %v812_v4  ;;  %v815_v0 = vadd.f32 1.4214138, %v811_v19  ;;  %v1030_v29 = vpop.eup %1029 }
 0x2e1   :  { %v810_v10 = vmul.f32 %v1022_v62, %v806_v6 }
 0x2e2   :  { %v825_v24 = vmul.f32 %v1016_v5, %v821_v61  ;;  %v820_v12 = vadd.f32 -0.28449672, %v816_v8  ;;  %v819_v13 = vmul.f32 %v1020_v14, %v815_v0 }
 0x2e3   :  { %v814_v15 = vadd.f32 1.4214138, %v810_v10 }
 0x2e4   :  { %v829_v16 = vadd.f32 0.2548296, %v825_v24  ;;  %v824_v21 = vmul.f32 %v1018_v53, %v820_v12  ;;  %v823_v22 = vadd.f32 -0.28449672, %v819_v13 }
 0x2e5   :  { %v818_v32 = vmul.f32 %v1022_v62, %v814_v15 }
 0x2e6   :  { %v833_v23 = vmul.f32 %v1016_v5, %v829_v16  ;;  %v828_v31 = vadd.f32 0.2548296, %v824_v21  ;;  %v827_v34 = vmul.f32 %v1020_v14, %v823_v22 }
 0x2e7   :  { %v822_v37 = vadd.f32 -0.28449672, %v818_v32 }
 0x2e8   :  { %v853_v25 = vmul.f32 %v1024_v30, %v833_v23  ;;  %v832_v38 = vmul.f32 %v1018_v53, %v828_v31  ;;  %v831_v40 = vadd.f32 0.2548296, %v827_v34 }
 0x2e9   :  { %v826_v43 = vmul.f32 %v1022_v62, %v822_v37 }
 0x2ea   :  { %v857_v42 = vsub.f32 1.0, %v853_v25  ;;  %v852_v45 = vmul.f32 %v1026_v41, %v832_v38  ;;  %v835_v27 = vmul.f32 %v1020_v14, %v831_v40  ;;  %v764_v14 = vmul.f32 0.5, %v1367_v18 }
 0x2eb   :  { %v830_v48 = vadd.f32 0.2548296, %v826_v43 }
 0x2ec   :  { %v861_v47 = vmul.f32 %v857_v42, %v777_v44  ;;  %v856_v5 = vsub.f32 1.0, %v852_v45  ;;  %v855_v17 = vmul.f32 %v1028_v46, %v835_v27 }
 0x2ed   :  { %v834_v52 = vmul.f32 %v1022_v62, %v830_v48 }
 0x2ee   :  { %v865_v28 = vadd.f32 1.0, %v861_v47  ;;  %v860_v53 = vmul.f32 %v856_v5, %v776_v51  ;;  %v859_v55 = vsub.f32 1.0, %v855_v17 }
 0x2ef   :  { %v854_v57 = vmul.f32 %v1030_v29, %v834_v52 }
 0x2f0   :  { %v869_v56 = vmul.f32 %v865_v28, %v765_v50  ;;  %v864_v33 = vadd.f32 1.0, %v860_v53  ;;  %v863_v35 = vmul.f32 %v859_v55, %v779_v20 }
 0x2f1   :  { %v858_v9 = vsub.f32 1.0, %v854_v57 }
 0x2f2   :  { %873 = vst.msk [vmem:[#allocation2 + $0x8] sm:$0xff] %vm499_vm15, %v869_v56  ;;  %v868_v58 = vmul.f32 %v864_v33, %v764_v14  ;;  %v867_v59 = vadd.f32 1.0, %v863_v35 }
 0x2f3   :  { %v862_v2 = vmul.f32 %v858_v9, %v778_v60 }
 0x2f4   :  { %872 = vst.msk [vmem:[#allocation2] sm:$0xff] %vm499_vm15, %v868_v58  ;;  %v871_v62 = vmul.f32 %v867_v59, %v767_v54 }
 0x2f5   :  { %v866_v18 = vadd.f32 1.0, %v862_v2 }
 0x2f6   :  { %875 = vst.msk [vmem:[#allocation2 + $0x18] sm:$0xff] %vm499_vm15, %v871_v62 }
 0x2f7   :  { %v870_v7 = vmul.f32 %v866_v18, %v766_v39 }
 0x2f9   :  { %874 = vst.msk [vmem:[#allocation2 + $0x10] sm:$0xff] %vm499_vm15, %v870_v7 }
 0x2fa   :  { %1042 = shalt.err (!%p1039_p4)
}
 0x2fb   :  { %s1060_s9 = smov 128  }
 0x2fc   :  { %887 = dma.vmem_to_hbm [thread:$0]  %s882_s6, 512, %s1416_s10, [#allocation3], %s1060_s9, %s1060_s9, %s1054_s22  }
 0x2fd   :  { %1051 = dma.done.wait [#allocation3], 512  }
 0x2fe   :  { %1052 = vsyncadd [#allocation3], 4294966784 }
 0x2ff   :  { %891 = vsyncpa [#allocation3], 1 }

</bundles_post_ra>
